<compile_context>
chip_gen: v5e
topology: v5e:2x2
jax: 0.10.0
libtpu: 0.0.40
codegen_flags: <defaults>
</compile_context>

<pallas_src>
import functools

import numpy as np
import jax
import jax.numpy as jnp
from jax import lax
from jax.experimental import pallas as pl
from jax.experimental.pallas import tpu as pltpu


# ----------------------------------------------------------------------------- utilities
def get_sinusoid_encoding_table(n_position, d_hid, padding_idx=None):
    """Same sinusoid position table as the PyTorch helper."""
    def cal_angle(position, hid_idx):
        return position / np.power(10000, 2 * (hid_idx // 2) / d_hid)

    table = np.array(
        [[cal_angle(pos, j) for j in range(d_hid)] for pos in range(n_position)],
        dtype=np.float64)
    table[:, 0::2] = np.sin(table[:, 0::2])
    table[:, 1::2] = np.cos(table[:, 1::2])
    if padding_idx is not None:
        table[padding_idx] = 0.0
    return jnp.asarray(table, jnp.float32)


# ----------------------------------------------------------------------------- kernel
def _attention_block_kernel(c_ref, q_ref, ohc_ref, ohq_ref, uc_ref, uq_ref,
                            tab_ref, wc_ref, wq_ref, wcq_ref,
                            out_ref, *, dropout_p):
    Lc, D = c_ref.shape[1], c_ref.shape[2]
    NEG = jnp.float32(-1e9)

    def dotT(a, b):
        # contract the last (lane) dim of both operands -> avoids explicit transposes
        return lax.dot_general(a, b, (((1,), (1,)), ((), ())),
                               preferred_element_type=jnp.float32)

    tab = tab_ref[...]                                   # (8, D) padded sinusoid table
    ohc = ohc_ref[0]                                     # (Lc, 8) one-hot(C_pos)
    ohq = ohq_ref[0]                                     # (Lq, 8) one-hot(Q_pos)

    # ---- x + img_order_enc(pos): frozen 6-row embedding, lookup via tiny one-hot matmul
    c = c_ref[0] + jnp.dot(ohc, tab, preferred_element_type=jnp.float32)   # (Lc, D)
    q = q_ref[0] + jnp.dot(ohq, tab, preferred_element_type=jnp.float32)   # (Lq, D)

    # ---- dropout(p=0.5), train-mode mask + scale; randomness supplied by the caller.
    # TODO(synk): RNG stream differs from torch's dropout; mask+scale semantics match.
    if dropout_p > 0.0:
        scale = jnp.float32(1.0 / (1.0 - dropout_p))
        c = jnp.where(uc_ref[0] >= dropout_p, c * scale, 0.0)
        q = jnp.where(uq_ref[0] >= dropout_p, q * scale, 0.0)

    # ---- masks: pos != PAD (PAD == 0)  <=>  one-hot column 0 is zero
    c_pad = ohc[:, 0:1]                                  # (Lc, 1): 1.0 where C_pos == PAD
    q_pad_row = ohq[:, 0:1].T                            # (1, Lq): 1.0 where Q_pos == PAD

    # ---- BiDAF trilinear similarity  S[i, j] = w_c.c_i + w_q.q_j + w_cq.(c_i * q_j)
    s = dotT(c * wcq_ref[...], q) + dotT(c, wc_ref[...]) + dotT(wq_ref[...], q)  # (Lc, Lq)

    # ---- context -> query attention (softmax over masked query positions)
    s_j = jnp.where(q_pad_row > 0.5, NEG, s)
    s_max = jnp.max(s_j, axis=-1, keepdims=True)
    e = jnp.exp(s_j - s_max)
    a = e / jnp.sum(e, axis=-1, keepdims=True)
    c2q = jnp.dot(a, q, preferred_element_type=jnp.float32)                 # (Lc, D)

    # ---- query -> context attention (softmax over masked context rows of max_j S)
    m = jnp.where(c_pad > 0.5, NEG, s_max)                                  # (Lc, 1)
    m_max = jnp.max(m, axis=0, keepdims=True)
    eb = jnp.exp(m - m_max)
    bw = eb / jnp.sum(eb, axis=0, keepdims=True)                            # (Lc, 1)
    q2c = lax.dot_general(bw, c, (((0,), (0,)), ((), ())),
                          preferred_element_type=jnp.float32)               # (1, D)

    # ---- G = [C; C2Q; C*C2Q; C*Q2C], written as four lane-aligned D-wide slabs
    out_ref[0, :, 0 * D:1 * D] = c
    out_ref[0, :, 1 * D:2 * D] = c2q
    out_ref[0, :, 2 * D:3 * D] = c * c2q
    out_ref[0, :, 3 * D:4 * D] = c * q2c                                    # broadcast (1,D)


# ----------------------------------------------------------------------------- wrapper
def attention_block(C, Q, C_pos, Q_pos, params, *, dropout_key=None,
                    dropout_p=0.5, training=True):
    """C: (B, Lc, D), Q: (B, Lq, D), C_pos/Q_pos: (B, Lc)/(B, Lq) int32 in [0, 6)."""
    B, Lc, D = C.shape
    _, Lq, _ = Q.shape
    NP = params["table"].shape[0]                        # padded table rows (8)

    oh_c = jax.nn.one_hot(C_pos, NP, dtype=jnp.float32)  # (B, Lc, NP)
    oh_q = jax.nn.one_hot(Q_pos, NP, dtype=jnp.float32)  # (B, Lq, NP)

    p = float(dropout_p) if training else 0.0
    if p > 0.0:
        if dropout_key is None:
            dropout_key = jax.random.PRNGKey(0)
        kc, kq = jax.random.split(dropout_key)
        u_c = jax.random.uniform(kc, (B, Lc, D), jnp.float32)
        u_q = jax.random.uniform(kq, (B, Lq, D), jnp.float32)
    else:
        u_c = jnp.ones((B, Lc, D), jnp.float32)
        u_q = jnp.ones((B, Lq, D), jnp.float32)

    kernel = functools.partial(_attention_block_kernel, dropout_p=p)

    out = pl.pallas_call(
        kernel,
        out_shape=jax.ShapeDtypeStruct((B, Lc, 4 * D), jnp.float32),
        grid_spec=pl.GridSpec(
            grid=(B,),
            in_specs=[
                pl.BlockSpec((1, Lc, D), lambda b: (b, 0, 0)),     # C
                pl.BlockSpec((1, Lq, D), lambda b: (b, 0, 0)),     # Q
                pl.BlockSpec((1, Lc, NP), lambda b: (b, 0, 0)),    # one-hot(C_pos)
                pl.BlockSpec((1, Lq, NP), lambda b: (b, 0, 0)),    # one-hot(Q_pos)
                pl.BlockSpec((1, Lc, D), lambda b: (b, 0, 0)),     # dropout uniforms (C)
                pl.BlockSpec((1, Lq, D), lambda b: (b, 0, 0)),     # dropout uniforms (Q)
                pl.BlockSpec((NP, D), lambda b: (0, 0)),           # sinusoid table (resident)
                pl.BlockSpec((1, D), lambda b: (0, 0)),            # w_c
                pl.BlockSpec((1, D), lambda b: (0, 0)),            # w_q
                pl.BlockSpec((1, D), lambda b: (0, 0)),            # w_cq
            ],
            out_specs=pl.BlockSpec((1, Lc, 4 * D), lambda b: (b, 0, 0)),
        ),
        compiler_params=pltpu.CompilerParams(dimension_semantics=("parallel",)),
    )(C.astype(jnp.float32), Q.astype(jnp.float32), oh_c, oh_q, u_c, u_q,
      params["table"], params["w_c"], params["w_q"], params["w_cq"])

    # PyTorch: return x.transpose(1, 2)  ->  (B, 4*D, Lc); the kernel stores the
    # lane-dense (Lc, 4*D) slab and the transpose is pure layout plumbing here.
    return jnp.swapaxes(out, 1, 2)


def init_params(key, d_model):
    """Frozen sinusoid image-order table (6 rows, padding_idx=0, zero-padded to 8)
    plus the BiDAF trilinear similarity weights."""
    tab6 = get_sinusoid_encoding_table(6, d_model, padding_idx=0)          # (6, D)
    table = jnp.zeros((8, d_model), jnp.float32).at[:6].set(tab6)          # (8, D)
    k = (3 * d_model) ** -0.5
    kc, kq, kx = jax.random.split(key, 3)
    u = lambda kk: jax.random.uniform(kk, (1, d_model), jnp.float32, -k, k)
    return dict(table=table, w_c=u(kc), w_q=u(kq), w_cq=u(kx))


if __name__ == "__main__":
    key = jax.random.PRNGKey(0)
    B, Lc, Lq, d_model = 2, 8, 8, 128

    k1, k2, k3, k4, k5, k6 = jax.random.split(key, 6)
    C = jax.random.normal(k1, (B, Lc, d_model), jnp.float32)
    Q = jax.random.normal(k2, (B, Lq, d_model), jnp.float32)
    C_pos = jax.random.randint(k3, (B, Lc), 0, 6, dtype=jnp.int32)   # 0 == PAD
    Q_pos = jax.random.randint(k4, (B, Lq), 0, 6, dtype=jnp.int32)

    params = init_params(k5, d_model)
    out = attention_block(C, Q, C_pos, Q_pos, params,
                          dropout_key=k6, dropout_p=0.5, training=True)
    out = jax.block_until_ready(out)

    assert out.shape == (B, 4 * d_model, Lc), out.shape
    assert bool(jnp.all(jnp.isfinite(out)))
    print("KERNEL_OK")
</pallas_src>

<mosaic_0001>
module attributes {stable_mosaic.version = 11 : i64} {
  func.func @_attention_block_kernel(%arg0: i32, %arg1: memref<1x8x128xf32, #tpu.memory_space<vmem>>, %arg2: memref<1x8x128xf32, #tpu.memory_space<vmem>>, %arg3: memref<1x8x8xf32, #tpu.memory_space<vmem>>, %arg4: memref<1x8x8xf32, #tpu.memory_space<vmem>>, %arg5: memref<1x8x128xf32, #tpu.memory_space<vmem>>, %arg6: memref<1x8x128xf32, #tpu.memory_space<vmem>>, %arg7: memref<8x128xf32, #tpu.memory_space<vmem>>, %arg8: memref<1x128xf32, #tpu.memory_space<vmem>>, %arg9: memref<1x128xf32, #tpu.memory_space<vmem>>, %arg10: memref<1x128xf32, #tpu.memory_space<vmem>>, %arg11: memref<1x8x512xf32, #tpu.memory_space<vmem>>) attributes {dimension_semantics = [#tpu.dimension_semantics<parallel>], iteration_bounds = array<i64: 2>, scalar_prefetch = 0 : i64, scratch_operands = 0 : i64, tpu.core_type = #tpu.core_type<tc>, window_params = [{transform_indices = @transform_0, window_bounds = array<i64: 1, 8, 128>}, {transform_indices = @transform_1, window_bounds = array<i64: 1, 8, 128>}, {transform_indices = @transform_2, window_bounds = array<i64: 1, 8, 8>}, {transform_indices = @transform_3, window_bounds = array<i64: 1, 8, 8>}, {transform_indices = @transform_4, window_bounds = array<i64: 1, 8, 128>}, {transform_indices = @transform_5, window_bounds = array<i64: 1, 8, 128>}, {pipeline_mode = #tpu.pipeline_mode<synchronous>, transform_indices = @transform_6, window_bounds = array<i64: 8, 128>}, {pipeline_mode = #tpu.pipeline_mode<synchronous>, transform_indices = @transform_7, window_bounds = array<i64: 1, 128>}, {pipeline_mode = #tpu.pipeline_mode<synchronous>, transform_indices = @transform_8, window_bounds = array<i64: 1, 128>}, {pipeline_mode = #tpu.pipeline_mode<synchronous>, transform_indices = @transform_9, window_bounds = array<i64: 1, 128>}, {transform_indices = @transform_10, window_bounds = array<i64: 1, 8, 512>}]} {
    %c0 = arith.constant 0 : index
    %c0_0 = arith.constant 0 : index
    %0 = vector.load %arg7[%c0, %c0_0] : memref<8x128xf32, #tpu.memory_space<vmem>>, vector<8x128xf32>
    %c0_1 = arith.constant 0 : index
    %c0_2 = arith.constant 0 : index
    %c0_3 = arith.constant 0 : index
    %1 = vector.load %arg3[%c0_1, %c0_2, %c0_3] : memref<1x8x8xf32, #tpu.memory_space<vmem>>, vector<1x8x8xf32>
    %2 = vector.shape_cast %1 : vector<1x8x8xf32> to vector<8x8xf32>
    %c0_4 = arith.constant 0 : index
    %c0_5 = arith.constant 0 : index
    %c0_6 = arith.constant 0 : index
    %3 = vector.load %arg4[%c0_4, %c0_5, %c0_6] : memref<1x8x8xf32, #tpu.memory_space<vmem>>, vector<1x8x8xf32>
    %4 = vector.shape_cast %3 : vector<1x8x8xf32> to vector<8x8xf32>
    %c0_7 = arith.constant 0 : index
    %c0_8 = arith.constant 0 : index
    %c0_9 = arith.constant 0 : index
    %5 = vector.load %arg1[%c0_7, %c0_8, %c0_9] : memref<1x8x128xf32, #tpu.memory_space<vmem>>, vector<1x8x128xf32>
    %6 = vector.shape_cast %5 : vector<1x8x128xf32> to vector<8x128xf32>
    %cst = arith.constant dense<0.000000e+00> : vector<8x128xf32>
    %7 = tpu.matmul %2, %0, %cst {dimension_numbers = #tpu.dot_dimension_numbers<[1], [0], [0], [1], [0, 0, 1, 1], [], []>} : vector<8x8xf32>, vector<8x128xf32>, vector<8x128xf32> -> vector<8x128xf32>
    %8 = arith.addf %6, %7 : vector<8x128xf32>
    %c0_10 = arith.constant 0 : index
    %c0_11 = arith.constant 0 : index
    %c0_12 = arith.constant 0 : index
    %9 = vector.load %arg2[%c0_10, %c0_11, %c0_12] : memref<1x8x128xf32, #tpu.memory_space<vmem>>, vector<1x8x128xf32>
    %10 = vector.shape_cast %9 : vector<1x8x128xf32> to vector<8x128xf32>
    %cst_13 = arith.constant dense<0.000000e+00> : vector<8x128xf32>
    %11 = tpu.matmul %4, %0, %cst_13 {dimension_numbers = #tpu.dot_dimension_numbers<[1], [0], [0], [1], [0, 0, 1, 1], [], []>} : vector<8x8xf32>, vector<8x128xf32>, vector<8x128xf32> -> vector<8x128xf32>
    %12 = arith.addf %10, %11 : vector<8x128xf32>
    %c0_14 = arith.constant 0 : index
    %c0_15 = arith.constant 0 : index
    %c0_16 = arith.constant 0 : index
    %13 = vector.load %arg5[%c0_14, %c0_15, %c0_16] : memref<1x8x128xf32, #tpu.memory_space<vmem>>, vector<1x8x128xf32>
    %14 = vector.shape_cast %13 : vector<1x8x128xf32> to vector<8x128xf32>
    %cst_17 = arith.constant 5.000000e-01 : f32
    %15 = vector.broadcast %cst_17 : f32 to vector<8x128xf32>
    %16 = arith.cmpf oge, %14, %15 : vector<8x128xf32>
    %cst_18 = arith.constant 2.000000e+00 : f32
    %17 = vector.broadcast %cst_18 : f32 to vector<8x128xf32>
    %18 = arith.mulf %8, %17 : vector<8x128xf32>
    %cst_19 = arith.constant 0.000000e+00 : f32
    %19 = vector.broadcast %cst_19 : f32 to vector<8x128xf32>
    %20 = arith.select %16, %18, %19 : vector<8x128xi1>, vector<8x128xf32>
    %c0_20 = arith.constant 0 : index
    %c0_21 = arith.constant 0 : index
    %c0_22 = arith.constant 0 : index
    %21 = vector.load %arg6[%c0_20, %c0_21, %c0_22] : memref<1x8x128xf32, #tpu.memory_space<vmem>>, vector<1x8x128xf32>
    %22 = vector.shape_cast %21 : vector<1x8x128xf32> to vector<8x128xf32>
    %cst_23 = arith.constant 5.000000e-01 : f32
    %23 = vector.broadcast %cst_23 : f32 to vector<8x128xf32>
    %24 = arith.cmpf oge, %22, %23 : vector<8x128xf32>
    %cst_24 = arith.constant 2.000000e+00 : f32
    %25 = vector.broadcast %cst_24 : f32 to vector<8x128xf32>
    %26 = arith.mulf %12, %25 : vector<8x128xf32>
    %cst_25 = arith.constant 0.000000e+00 : f32
    %27 = vector.broadcast %cst_25 : f32 to vector<8x128xf32>
    %28 = arith.select %24, %26, %27 : vector<8x128xi1>, vector<8x128xf32>
    %29 = vector.extract_strided_slice %2 {offsets = [0, 0], sizes = [8, 1], strides = [1, 1]} : vector<8x8xf32> to vector<8x1xf32>
    %30 = vector.extract_strided_slice %4 {offsets = [0, 0], sizes = [8, 1], strides = [1, 1]} : vector<8x8xf32> to vector<8x1xf32>
    %31 = tpu.transpose %30, [1, 0] : vector<8x1xf32> -> vector<1x8xf32>
    %c0_26 = arith.constant 0 : index
    %c0_27 = arith.constant 0 : index
    %32 = vector.load %arg10[%c0_26, %c0_27] : memref<1x128xf32, #tpu.memory_space<vmem>>, vector<1x128xf32>
    %33 = vector.broadcast %32 : vector<1x128xf32> to vector<8x128xf32>
    %34 = arith.mulf %20, %33 : vector<8x128xf32>
    %cst_28 = arith.constant dense<0.000000e+00> : vector<8x8xf32>
    %35 = tpu.matmul %34, %28, %cst_28 {dimension_numbers = #tpu.dot_dimension_numbers<[1], [1], [0], [0], [0, 0, 1, 0], [], []>} : vector<8x128xf32>, vector<8x128xf32>, vector<8x8xf32> -> vector<8x8xf32>
    %c0_29 = arith.constant 0 : index
    %c0_30 = arith.constant 0 : index
    %36 = vector.load %arg8[%c0_29, %c0_30] : memref<1x128xf32, #tpu.memory_space<vmem>>, vector<1x128xf32>
    %cst_31 = arith.constant dense<0.000000e+00> : vector<8x1xf32>
    %37 = tpu.matmul %20, %36, %cst_31 {dimension_numbers = #tpu.dot_dimension_numbers<[1], [1], [0], [0], [0, 0, 1, 0], [], []>} : vector<8x128xf32>, vector<1x128xf32>, vector<8x1xf32> -> vector<8x1xf32>
    %38 = vector.broadcast %37 : vector<8x1xf32> to vector<8x8xf32>
    %39 = arith.addf %35, %38 : vector<8x8xf32>
    %c0_32 = arith.constant 0 : index
    %c0_33 = arith.constant 0 : index
    %40 = vector.load %arg9[%c0_32, %c0_33] : memref<1x128xf32, #tpu.memory_space<vmem>>, vector<1x128xf32>
    %cst_34 = arith.constant dense<0.000000e+00> : vector<1x8xf32>
    %41 = tpu.matmul %40, %28, %cst_34 {dimension_numbers = #tpu.dot_dimension_numbers<[1], [1], [0], [0], [0, 0, 1, 0], [], []>} : vector<1x128xf32>, vector<8x128xf32>, vector<1x8xf32> -> vector<1x8xf32>
    %42 = vector.broadcast %41 : vector<1x8xf32> to vector<8x8xf32>
    %43 = arith.addf %39, %42 : vector<8x8xf32>
    %cst_35 = arith.constant 5.000000e-01 : f32
    %44 = vector.broadcast %cst_35 : f32 to vector<1x8xf32>
    %45 = arith.cmpf ogt, %31, %44 : vector<1x8xf32>
    %cst_36 = arith.constant -1.000000e+09 : f32
    %46 = vector.shape_cast %45 : vector<1x8xi1> to vector<1x8xi1>
    %47 = vector.broadcast %46 : vector<1x8xi1> to vector<8x8xi1>
    %48 = vector.broadcast %cst_36 : f32 to vector<8x8xf32>
    %49 = arith.select %47, %48, %43 : vector<8x8xi1>, vector<8x8xf32>
    %cst_37 = arith.constant dense<0xFF800000> : vector<8xf32>
    %50 = vector.multi_reduction <maximumf>, %49, %cst_37 [1] : vector<8x8xf32> to vector<8xf32>
    %51 = vector.shape_cast %50 : vector<8xf32> to vector<8x1xf32>
    %52 = vector.broadcast %51 : vector<8x1xf32> to vector<8x8xf32>
    %53 = arith.subf %49, %52 : vector<8x8xf32>
    %54 = math.exp %53 : vector<8x8xf32>
    %cst_38 = arith.constant dense<0.000000e+00> : vector<8xf32>
    %55 = vector.multi_reduction <add>, %54, %cst_38 [1] : vector<8x8xf32> to vector<8xf32>
    %56 = vector.shape_cast %55 : vector<8xf32> to vector<8x1xf32>
    %57 = vector.broadcast %56 : vector<8x1xf32> to vector<8x8xf32>
    %58 = arith.divf %54, %57 : vector<8x8xf32>
    %cst_39 = arith.constant dense<0.000000e+00> : vector<8x128xf32>
    %59 = tpu.matmul %58, %28, %cst_39 {dimension_numbers = #tpu.dot_dimension_numbers<[1], [0], [0], [1], [0, 0, 1, 1], [], []>} : vector<8x8xf32>, vector<8x128xf32>, vector<8x128xf32> -> vector<8x128xf32>
    %cst_40 = arith.constant 5.000000e-01 : f32
    %60 = vector.broadcast %cst_40 : f32 to vector<8x1xf32>
    %61 = arith.cmpf ogt, %29, %60 : vector<8x1xf32>
    %cst_41 = arith.constant -1.000000e+09 : f32
    %62 = vector.broadcast %cst_41 : f32 to vector<8x1xf32>
    %63 = arith.select %61, %62, %51 : vector<8x1xi1>, vector<8x1xf32>
    %cst_42 = arith.constant dense<0xFF800000> : vector<1xf32>
    %64 = vector.multi_reduction <maximumf>, %63, %cst_42 [0] : vector<8x1xf32> to vector<1xf32>
    %65 = vector.shape_cast %64 : vector<1xf32> to vector<1x1xf32>
    %66 = vector.broadcast %65 : vector<1x1xf32> to vector<8x1xf32>
    %67 = arith.subf %63, %66 : vector<8x1xf32>
    %68 = math.exp %67 : vector<8x1xf32>
    %cst_43 = arith.constant dense<0.000000e+00> : vector<1xf32>
    %69 = vector.multi_reduction <add>, %68, %cst_43 [0] : vector<8x1xf32> to vector<1xf32>
    %70 = vector.shape_cast %69 : vector<1xf32> to vector<1x1xf32>
    %71 = vector.broadcast %70 : vector<1x1xf32> to vector<8x1xf32>
    %72 = arith.divf %68, %71 : vector<8x1xf32>
    %cst_44 = arith.constant dense<0.000000e+00> : vector<1x128xf32>
    %73 = tpu.matmul %72, %20, %cst_44 {dimension_numbers = #tpu.dot_dimension_numbers<[0], [0], [1], [1], [0, 1, 1, 1], [], []>} : vector<8x1xf32>, vector<8x128xf32>, vector<1x128xf32> -> vector<1x128xf32>
    %c0_45 = arith.constant 0 : index
    %c0_46 = arith.constant 0 : index
    %c0_47 = arith.constant 0 : index
    %74 = vector.load %arg11[%c0_45, %c0_46, %c0_47] : memref<1x8x512xf32, #tpu.memory_space<vmem>>, vector<1x8x128xf32>
    %75 = vector.shape_cast %74 : vector<1x8x128xf32> to vector<8x128xf32>
    %76 = vector.shape_cast %20 : vector<8x128xf32> to vector<1x8x128xf32>
    tpu.vector_store %arg11[%c0_45, %c0_46, %c0_47], %76 {strides = array<i32>} : memref<1x8x512xf32, #tpu.memory_space<vmem>>, vector<1x8x128xf32>,
    %c0_48 = arith.constant 0 : index
    %c0_49 = arith.constant 0 : index
    %c128 = arith.constant 128 : index
    %77 = vector.load %arg11[%c0_48, %c0_49, %c128] : memref<1x8x512xf32, #tpu.memory_space<vmem>>, vector<1x8x128xf32>
    %78 = vector.shape_cast %77 : vector<1x8x128xf32> to vector<8x128xf32>
    %79 = vector.shape_cast %59 : vector<8x128xf32> to vector<1x8x128xf32>
    tpu.vector_store %arg11[%c0_48, %c0_49, %c128], %79 {strides = array<i32>} : memref<1x8x512xf32, #tpu.memory_space<vmem>>, vector<1x8x128xf32>,
    %80 = arith.mulf %20, %59 : vector<8x128xf32>
    %c0_50 = arith.constant 0 : index
    %c0_51 = arith.constant 0 : index
    %c256 = arith.constant 256 : index
    %81 = vector.load %arg11[%c0_50, %c0_51, %c256] : memref<1x8x512xf32, #tpu.memory_space<vmem>>, vector<1x8x128xf32>
    %82 = vector.shape_cast %81 : vector<1x8x128xf32> to vector<8x128xf32>
    %83 = vector.shape_cast %80 : vector<8x128xf32> to vector<1x8x128xf32>
    tpu.vector_store %arg11[%c0_50, %c0_51, %c256], %83 {strides = array<i32>} : memref<1x8x512xf32, #tpu.memory_space<vmem>>, vector<1x8x128xf32>,
    %84 = vector.broadcast %73 : vector<1x128xf32> to vector<8x128xf32>
    %85 = arith.mulf %20, %84 : vector<8x128xf32>
    %c0_52 = arith.constant 0 : index
    %c0_53 = arith.constant 0 : index
    %c384 = arith.constant 384 : index
    %86 = vector.load %arg11[%c0_52, %c0_53, %c384] : memref<1x8x512xf32, #tpu.memory_space<vmem>>, vector<1x8x128xf32>
    %87 = vector.shape_cast %86 : vector<1x8x128xf32> to vector<8x128xf32>
    %88 = vector.shape_cast %85 : vector<8x128xf32> to vector<1x8x128xf32>
    tpu.vector_store %arg11[%c0_52, %c0_53, %c384], %88 {strides = array<i32>} : memref<1x8x512xf32, #tpu.memory_space<vmem>>, vector<1x8x128xf32>,
    return
  }
  func.func @transform_0(%arg0: i32) -> (i32, i32, i32) {
    %c0_i32 = arith.constant 0 : i32
    %c0_i32_0 = arith.constant 0 : i32
    %c0_i32_1 = arith.constant 0 : i32
    return %arg0, %c0_i32, %c0_i32_0 : i32, i32, i32
  }
  func.func @transform_1(%arg0: i32) -> (i32, i32, i32) {
    %c0_i32 = arith.constant 0 : i32
    %c0_i32_0 = arith.constant 0 : i32
    %c0_i32_1 = arith.constant 0 : i32
    return %arg0, %c0_i32, %c0_i32_0 : i32, i32, i32
  }
  func.func @transform_2(%arg0: i32) -> (i32, i32, i32) {
    %c0_i32 = arith.constant 0 : i32
    %c0_i32_0 = arith.constant 0 : i32
    %c0_i32_1 = arith.constant 0 : i32
    return %arg0, %c0_i32, %c0_i32_0 : i32, i32, i32
  }
  func.func @transform_3(%arg0: i32) -> (i32, i32, i32) {
    %c0_i32 = arith.constant 0 : i32
    %c0_i32_0 = arith.constant 0 : i32
    %c0_i32_1 = arith.constant 0 : i32
    return %arg0, %c0_i32, %c0_i32_0 : i32, i32, i32
  }
  func.func @transform_4(%arg0: i32) -> (i32, i32, i32) {
    %c0_i32 = arith.constant 0 : i32
    %c0_i32_0 = arith.constant 0 : i32
    %c0_i32_1 = arith.constant 0 : i32
    return %arg0, %c0_i32, %c0_i32_0 : i32, i32, i32
  }
  func.func @transform_5(%arg0: i32) -> (i32, i32, i32) {
    %c0_i32 = arith.constant 0 : i32
    %c0_i32_0 = arith.constant 0 : i32
    %c0_i32_1 = arith.constant 0 : i32
    return %arg0, %c0_i32, %c0_i32_0 : i32, i32, i32
  }
  func.func @transform_6(%arg0: i32) -> (i32, i32) {
    %c0_i32 = arith.constant 0 : i32
    %c0_i32_0 = arith.constant 0 : i32
    %c0_i32_1 = arith.constant 0 : i32
    return %c0_i32, %c0_i32_0 : i32, i32
  }
  func.func @transform_7(%arg0: i32) -> (i32, i32) {
    %c0_i32 = arith.constant 0 : i32
    %c0_i32_0 = arith.constant 0 : i32
    %c0_i32_1 = arith.constant 0 : i32
    return %c0_i32, %c0_i32_0 : i32, i32
  }
  func.func @transform_8(%arg0: i32) -> (i32, i32) {
    %c0_i32 = arith.constant 0 : i32
    %c0_i32_0 = arith.constant 0 : i32
    %c0_i32_1 = arith.constant 0 : i32
    return %c0_i32, %c0_i32_0 : i32, i32
  }
  func.func @transform_9(%arg0: i32) -> (i32, i32) {
    %c0_i32 = arith.constant 0 : i32
    %c0_i32_0 = arith.constant 0 : i32
    %c0_i32_1 = arith.constant 0 : i32
    return %c0_i32, %c0_i32_0 : i32, i32
  }
  func.func @transform_10(%arg0: i32) -> (i32, i32, i32) {
    %c0_i32 = arith.constant 0 : i32
    %c0_i32_0 = arith.constant 0 : i32
    %c0_i32_1 = arith.constant 0 : i32
    return %arg0, %c0_i32, %c0_i32_0 : i32, i32, i32
  }
}

</mosaic_0001>

<bundles_post_ra>
// kernel: tpu_custom_call.1
= control target key start
LH: loop header
LB: loop body
LE: loop exit
PB: predicated region body
PF: predicated region fallthrough
CT: control target
= control target key end

     0   :  { %s1867_s0 = inlined_call_operand.hbm [shape: f32[2,8,128], index: 0, kind: input, shape index: {}]   ;;  %s1868_s1 = inlined_call_operand.hbm [shape: f32[2,8,128], index: 1, kind: input, shape index: {}]   ;;  %s1869_s2 = inlined_call_operand.hbm [shape: f32[2,8,8], index: 2, kind: input, shape index: {}]   ;;  %s1870_s3 = inlined_call_operand.hbm [shape: f32[2,8,8], index: 3, kind: input, shape index: {}]   ;;  %s1871_s4 = inlined_call_operand.hbm [shape: f32[2,8,128], index: 4, kind: input, shape index: {}]   ;;  %s1872_s5 = inlined_call_operand.hbm [shape: f32[2,8,128], index: 5, kind: input, shape index: {}]   ;;  %s1873_s6 = inlined_call_operand.hbm [shape: f32[8,128], index: 6, kind: input, shape index: {}]   ;;  %s1874_s7 = inlined_call_operand.vmem [shape: f32[1,128], index: 7, kind: input, shape index: {}]   ;;  %s1875_s8 = inlined_call_operand.vmem [shape: f32[1,128], index: 8, kind: input, shape index: {}]   ;;  %s1876_s9 = inlined_call_operand.vmem [shape: f32[1,128], index: 9, kind: input, shape index: {}]   ;;  %s1877_s10 = inlined_call_operand.hbm [shape: f32[2,8,512], index: 10, kind: output, shape index: {}]  }
   0x1   :  { %1889 = sst [smem:[#allocation27_spill]] %s1868_s1 }
   0x2   :  { %1890 = sst [smem:[#allocation28_spill]] %s1873_s6 }
   0x3   :  { %1891 = sst [smem:[#allocation29_spill]] %s1875_s8 }
   0x4   :  { %1892 = sst [smem:[#allocation30_spill]] %s1877_s10 }
   0x5   :  { %15 = vsyncpa [#allocation3], 0 }
   0x6   :  { %17 = vsyncpa [#allocation3 + $0x1], 0 }
   0x7   :  { %18 = vsyncpa [#allocation6], 0 }
   0x8   :  { %20 = vsyncpa [#allocation6 + $0x1], 0 }
   0x9   :  { %21 = vsyncpa [#allocation9], 0 }
   0xa   :  { %23 = vsyncpa [#allocation9 + $0x1], 0 }
   0xb   :  { %24 = vsyncpa [#allocation12], 0 }
   0xc   :  { %26 = vsyncpa [#allocation12 + $0x1], 0 }
   0xd   :  { %27 = vsyncpa [#allocation4], 0 }
   0xe   :  { %29 = vsyncpa [#allocation4 + $0x1], 0  ;;  %s1567_s13 = smov 0   ;;  %s1569_s14 = smov 0  }
   0xf   :  { %s1571_s15 = smov 0   ;;  %s1573_s16 = smov 0  }
  0x10 LB: > { %1893 = sst [smem:[#allocation21_spill]] %s1496_s13  ;;  %s1588_s17 = sadd.s32 4294967295, %s1508_s16   ;;  %s1508_s16 = sphi %s1573_s16, %s1918_s16   ;;  %s1504_s15 = sphi %s1571_s15, %s1922_s15   ;;  %s1500_s14 = sphi %s1569_s14, %s1921_s14   ;;  %s1496_s13 = sphi %s1567_s13, %s1920_s13  }
  0x11   : > { %1894 = sst [smem:[#allocation22_spill]] %s1508_s16  ;;  %s1083_s18 = sadd.s32 4294967294, %s1508_s16  }
  0x12   : > { %s1592_s19 = sadd.s32 1, %s1508_s16   ;;  %s42_s20 = sadd.s32 1, %s1504_s15 }
  0x13   : > { %1895 = sst [smem:[#allocation23_spill]] %s1592_s19  ;;  %s39_s21 = ssub.s32 %s1508_s16, %s1592_s19 }
  0x14   : > { %p49_p0 = scmp.ne.s32.totalorder %s1504_s15, %s1500_s14  ;;  %p40_p1 = scmp.eq.s32.totalorder %s39_s21, 0 }
  0x15   : > { %p50_p2 = scmp.eq.s32.totalorder %s1508_s16, 0  ;;  %p55_p3 = scmp.ne.s32.totalorder %s1500_s14, %s1496_s13 }
  0x16   : > { %p56_p4 = scmp.eq.s32.totalorder %s1588_s17, 0  ;;  %p293_p7 = scmp.eq.s32.totalorder %s1588_s17, 1 }
  0x17   : > { %s1604_s22 = scalar_select %p40_p1, %s1504_s15, %s42_s20  }
  0x18   : > { %p1606_p5 = por %p50_p2, %p49_p0  ;;  %p1612_p6 = por %p56_p4, %p55_p3 }
  0x19   : > { %1896 = sst [smem:[#allocation24_spill]] %s1604_s22  ;;  %p299_p8 = scmp.eq.s32.totalorder %s1083_s18, 1 }
  0x1a   : > { %p1084_p9 = scmp.ge.s32.totalorder %s1508_s16, 1  ;;  %p306_p10 = scmp.lt.s32.totalorder %s1508_s16, 3 }
  0x1b   : > { %p1619_p11 = por %p293_p7, %p49_p0  ;;  %p1623_p12 = por %p299_p8, %p55_p3 }
  0x1c   : > { %p1627_p13 = pnand %p1084_p9, %p306_p10  ;;  %s1904_s6 = sld [smem:[#allocation28_spill]] }
  0x1d   : > { %s1899_s25 = scalar_select %p1619_p11, 1, 0 }
  0x1e   : > { %s1901_s26 = scalar_select %p1623_p12, 1, 0 }
  0x1f   : > { %1900 = sst [smem:[#allocation25_spill]] %s1899_s25  ;;  %p1140_p0 = pneg %p1627_p13 }
  0x20   : > { %1902 = sst [smem:[#allocation26_spill]] %s1901_s26  ;;  %s1510_s11 = smov [#allocation13]  }
  0x21   : > { %s320_s12 = sshll.u32 %s1510_s11, 4  ;;  %p1141_p2 = pnand %p1140_p0, %p56_p4  ;;  %s321_s12 = int_to_ptr.vmem [resolvable:$true] %s320_s12 }
  0x22   : > { %s318_s30 = sshll.u32 %s1904_s6, 4  ;;  %p1168_p3 = scmp.lt.s32.totalorder %s1508_s16, 2  ;;  %s319_s30 = int_to_ptr.hbm [resolvable:$true] %s318_s30 }
  0x23   : > { %s1878_s18 = sand.u32 1, %s1504_s15   ;;  %s1652_s28 = sshll.u32 %s1508_s16, 3 }
  0x24   : > { %s1643_s20 = sshll.u32 %s1878_s18, 3  ;;  %p1647_p7 = pnand %p1168_p3, %p1606_p5 }
  0x25   : > { %1143 = dma.hbm_to_vmem [thread:$0]  (!%p1141_p2), %s319_s30, 128, %s321_s12, [#allocation12]  }
  0x26   : > { %s1655_s29 = sand.u32 1, %s1508_s16   ;;  %s1906_s1 = sld [smem:[#allocation27_spill]] }
  0x27   : > { %s363_s18 = scalar_lea.vmem [#allocation5], %s1643_s20  ;;  %s1887_s23 = scalar_lea.sflag [#allocation6], %s1655_s29 }
  0x28   : > { %s371_s19 = sshll.u32 %s363_s18, 4  ;;  %p1665_p8 = pneg %p1647_p7  ;;  %s372_s19 = int_to_ptr.vmem [resolvable:$true] %s371_s19 }
  0x2c   : > { %s367_s22 = scalar_lea.hbm %s1906_s1, %s1652_s28 }
  0x2d   : > { %s369_s26 = sshll.u32 %s367_s22, 4  ;;  %s1253_s22 = scalar_lea.hbm %s1906_s1, 16  ;;  %s370_s26 = int_to_ptr.hbm [resolvable:$true] %s369_s26 }
  0x2e   : > { %s1246_s30 = sshra.s32 %s370_s26, 4  ;;  %s1247_s30 = int_to_ptr.hbm [resolvable:$true] %s1246_s30 }
  0x2f   : > { %s1248_s12 = scalar_lea.hbm %s1247_s30, 8  ;;  %p1254_p0 = scmp.lt.s32.totalorder %s1247_s30, %s1906_s1 }
  0x30   : > { %p1249_p5 = scmp.ne.s32.totalorder %s1247_s30, %s1248_s12  ;;  %p1255_p2 = scmp.lt.s32.totalorder %s1253_s22, %s1248_s12 }
  0x32   : > { %p1251_p9 = pnand %p1665_p8, %p1249_p5  ;;  %p1256_p3 = por %p1255_p2, %p1254_p0 }
  0x34   : > { %p1252_p10 = pneg %p1251_p9 }
  0x36   : > { %p1257_p1 = pnand %p1256_p3, %p1252_p10 }
  0x38   : > { %1260 = shalt.err (!%p1257_p1)
}
  0x39   : > { %1150 = dma.hbm_to_vmem [thread:$0]  (!%p1647_p7), %s370_s26, 128, %s372_s19, %s1887_s23  }
  0x3a   : > { %s405_s11 = scalar_lea.hbm %s1870_s3, %s1652_s28  ;;  %s401_s16 = scalar_lea.vmem [#allocation8], %s1643_s20 }
  0x3b   : > { %s407_s25 = sshll.u32 %s405_s11, 4  ;;  %s409_s30 = sshll.u32 %s401_s16, 4  ;;  %s408_s25 = int_to_ptr.hbm [resolvable:$true] %s407_s25  ;;  %s410_s30 = int_to_ptr.vmem [resolvable:$true] %s409_s30 }
  0x3c   : > { %s1888_s12 = scalar_lea.sflag [#allocation9], %s1655_s29  ;;  %s1276_s22 = sshra.s32 %s408_s25, 4  ;;  %s1277_s22 = int_to_ptr.hbm [resolvable:$true] %s1276_s22 }
  0x3d   : > { %s1278_s18 = scalar_lea.hbm %s1277_s22, 8  ;;  %s1283_s19 = scalar_lea.hbm %s1870_s3, 16 }
  0x3e   : > { %p1279_p1 = scmp.ne.s32.totalorder %s1277_s22, %s1278_s18  ;;  %p1284_p10 = scmp.lt.s32.totalorder %s1277_s22, %s1870_s3 }
  0x3f   : > { %p1285_p0 = scmp.lt.s32.totalorder %s1283_s19, %s1278_s18 }
  0x40   : > { %p1281_p5 = pnand %p1279_p1, %p1665_p8 }
  0x41   : > { %p1286_p2 = por %p1285_p0, %p1284_p10 }
  0x42   : > { %p1282_p9 = pneg %p1281_p5 }
  0x44   : > { %p1287_p3 = pnand %p1286_p2, %p1282_p9 }
  0x46   : > { %1290 = shalt.err (!%p1287_p3)
}
  0x47   : > { %1156 = dma.hbm_to_vmem [thread:$0]  (!%p1647_p7), %s408_s25, 128, %s410_s30, %s1888_s12  }
  0x48   : > { %s348_s8 = scalar_lea.hbm %s1867_s0, %s1652_s28  ;;  %s344_s11 = scalar_lea.vmem [#allocation2], %s1643_s20 }
  0x49   : > { %s352_s16 = sshll.u32 %s344_s11, 4  ;;  %s350_s22 = sshll.u32 %s348_s8, 4  ;;  %s353_s16 = int_to_ptr.vmem [resolvable:$true] %s352_s16  ;;  %s351_s22 = int_to_ptr.hbm [resolvable:$true] %s350_s22 }
  0x4a   : > { %s1908_s18 = sand.u32 1, %s1504_s15   ;;  %s1306_s26 = sshra.s32 %s351_s22, 4  ;;  %s1307_s26 = int_to_ptr.hbm [resolvable:$true] %s1306_s26 }
  0x4b   : > { %s341_s19 = scalar_lea.sflag [#allocation3], %s1908_s18  ;;  %s1308_s10 = scalar_lea.hbm %s1307_s26, 8 }
  0x4c   : > { %p1309_p1 = scmp.ne.s32.totalorder %s1307_s26, %s1308_s10  ;;  %s1313_s30 = scalar_lea.hbm %s1867_s0, 16 }
  0x4d   : > { %p1314_p10 = scmp.lt.s32.totalorder %s1307_s26, %s1867_s0  ;;  %p1315_p0 = scmp.lt.s32.totalorder %s1313_s30, %s1308_s10 }
  0x4e   : > { %p1311_p5 = pnand %p1309_p1, %p1665_p8 }
  0x4f   : > { %p1316_p2 = por %p1315_p0, %p1314_p10 }
  0x50   : > { %p1312_p9 = pneg %p1311_p5 }
  0x52   : > { %p1317_p3 = pnand %p1316_p2, %p1312_p9 }
  0x54   : > { %1320 = shalt.err (!%p1317_p3)
}
  0x55   : > { %1147 = dma.hbm_to_vmem [thread:$0]  (!%p1647_p7), %s351_s22, 128, %s353_s16, %s341_s19  }
  0x56   : > { %s386_s18 = scalar_lea.hbm %s1869_s2, %s1652_s28  ;;  %s382_s23 = scalar_lea.vmem [#allocation7], %s1643_s20 }
  0x57   : > { %s390_s25 = sshll.u32 %s382_s23, 4  ;;  %s388_s12 = sshll.u32 %s386_s18, 4  ;;  %s391_s25 = int_to_ptr.vmem [resolvable:$true] %s390_s25  ;;  %s389_s12 = int_to_ptr.hbm [resolvable:$true] %s388_s12 }
  0x58   : > { %s1336_s26 = sshra.s32 %s389_s12, 4  ;;  %s1343_s16 = scalar_lea.hbm %s1869_s2, 16  ;;  %s1337_s26 = int_to_ptr.hbm [resolvable:$true] %s1336_s26 }
  0x59   : > { %s1338_s10 = scalar_lea.hbm %s1337_s26, 8  ;;  %p1344_p10 = scmp.lt.s32.totalorder %s1337_s26, %s1869_s2 }
  0x5a   : > { %p1339_p1 = scmp.ne.s32.totalorder %s1337_s26, %s1338_s10  ;;  %p1345_p0 = scmp.lt.s32.totalorder %s1343_s16, %s1338_s10 }
  0x5c   : > { %p1341_p5 = pnand %p1339_p1, %p1665_p8  ;;  %p1346_p2 = por %p1345_p0, %p1344_p10 }
  0x5e   : > { %p1342_p9 = pneg %p1341_p5 }
  0x60   : > { %p1347_p3 = pnand %p1346_p2, %p1342_p9 }
  0x62   : > { %1350 = shalt.err (!%p1347_p3)
}
  0x63   : > { %s1909_s1 = scalar_lea.sflag [#allocation6], %s1655_s29  ;;  %s424_s18 = scalar_lea.hbm %s1871_s4, %s1652_s28 }
  0x64   : > { %1153 = dma.hbm_to_vmem [thread:$0]  (!%p1647_p7), %s389_s12, 128, %s391_s25, %s1909_s1  }
  0x65   : > { %s420_s23 = scalar_lea.vmem [#allocation10], %s1643_s20  ;;  %s426_s6 = sshll.u32 %s424_s18, 4  ;;  %s427_s6 = int_to_ptr.hbm [resolvable:$true] %s426_s6 }
  0x66   : > { %s428_s30 = sshll.u32 %s420_s23, 4  ;;  %s1366_s26 = sshra.s32 %s427_s6, 4  ;;  %s429_s30 = int_to_ptr.vmem [resolvable:$true] %s428_s30  ;;  %s1367_s26 = int_to_ptr.hbm [resolvable:$true] %s1366_s26 }
  0x67   : > { %s1368_s10 = scalar_lea.hbm %s1367_s26, 8  ;;  %s1373_s12 = scalar_lea.hbm %s1871_s4, 16 }
  0x68   : > { %p1369_p1 = scmp.ne.s32.totalorder %s1367_s26, %s1368_s10  ;;  %p1374_p10 = scmp.lt.s32.totalorder %s1367_s26, %s1871_s4 }
  0x69   : > { %p1375_p0 = scmp.lt.s32.totalorder %s1373_s12, %s1368_s10 }
  0x6a   : > { %p1371_p5 = pnand %p1369_p1, %p1665_p8 }
  0x6b   : > { %p1376_p2 = por %p1375_p0, %p1374_p10 }
  0x6c   : > { %p1372_p9 = pneg %p1371_p5 }
  0x6e   : > { %p1377_p3 = pnand %p1376_p2, %p1372_p9 }
  0x70   : > { %1380 = shalt.err (!%p1377_p3)
}
  0x71   : > { %s1910_s1 = scalar_lea.sflag [#allocation9], %s1655_s29  ;;  %s443_s18 = scalar_lea.hbm %s1872_s5, %s1652_s28 }
  0x72   : > { %1159 = dma.hbm_to_vmem [thread:$0]  (!%p1647_p7), %s427_s6, 128, %s429_s30, %s1910_s1  }
  0x73   : > { %s445_s23 = sshll.u32 %s443_s18, 4  ;;  %s439_s16 = scalar_lea.vmem [#allocation11], %s1643_s20  ;;  %s446_s23 = int_to_ptr.hbm [resolvable:$true] %s445_s23 }
  0x74   : > { %s447_s26 = sshll.u32 %s439_s16, 4  ;;  %s436_s10 = scalar_lea.sflag [#allocation12], %s1655_s29  ;;  %s448_s26 = int_to_ptr.vmem [resolvable:$true] %s447_s26 }
  0x75   : > { %s1396_s22 = sshra.s32 %s446_s23, 4  ;;  %s1403_s30 = scalar_lea.hbm %s1872_s5, 16  ;;  %s1397_s22 = int_to_ptr.hbm [resolvable:$true] %s1396_s22 }
  0x76   : > { %s1398_s12 = scalar_lea.hbm %s1397_s22, 8  ;;  %p1404_p10 = scmp.lt.s32.totalorder %s1397_s22, %s1872_s5 }
  0x77   : > { %p1399_p1 = scmp.ne.s32.totalorder %s1397_s22, %s1398_s12  ;;  %p1405_p0 = scmp.lt.s32.totalorder %s1403_s30, %s1398_s12 }
  0x79   : > { %p1401_p5 = pnand %p1399_p1, %p1665_p8  ;;  %p1406_p2 = por %p1405_p0, %p1404_p10 }
  0x7b   : > { %p1402_p9 = pneg %p1401_p5 }
  0x7d   : > { %p1407_p3 = pnand %p1406_p2, %p1402_p9 }
  0x7f   : > { %1410 = shalt.err (!%p1407_p3)
}
  0x80   : > { %1162 = dma.hbm_to_vmem [thread:$0]  (!%p1647_p7), %s446_s23, 128, %s448_s26, %s436_s10  }
  0x81   : > { %456 = sbr.rel (%p1627_p13) target bundleno = 954 (0x3ba), region = 60  ;;  %s1769_s13 = sand.u32 (!%p1627_p13), 1, %s1500_s14  }
  0x82   : > { %s1772_s20 = sshll.u32 (!%p1627_p13), %s1769_s13, 3  ;;  %s459_s28 = scalar_lea.sflag (!%p1627_p13), [#allocation3], %s1769_s13 }
  0x83   : > { %s462_s29 = scalar_lea.vmem (!%p1627_p13), [#allocation2], %s1772_s20 }
  0x86   : > { %1471 = dma.done.wait (%p1612_p6), %s459_s28, 128  }
  0x87   : > { %1473 = vsyncadd (%p1612_p6), %s459_s28, 4294967168  ;;  %s468_s27 = sand.u32 1, %s1588_s17   ;;  %s472_s8 = scalar_lea.vmem [#allocation5], %s1772_s20 }
  0x88   : > { %s469_s21 = scalar_lea.sflag [#allocation6], %s468_s27 }
  0x89   : > { %1475 = dma.done.wait (%p1612_p6), %s469_s21, 256  }
  0x8a   : > { %1477 = vsyncadd (%p1612_p6), %s469_s21, 4294967040  ;;  %s482_s11 = scalar_lea.vmem [#allocation7], %s1772_s20  ;;  %s489_s18 = scalar_lea.sflag [#allocation9], %s468_s27 }
  0x8b   : > { %s492_s23 = scalar_lea.vmem [#allocation8], %s1772_s20 }
  0x8c   : > { %1479 = dma.done.wait (%p1612_p6), %s489_s18, 256  }
  0x8d   : > { %1481 = vsyncadd (%p1612_p6), %s489_s18, 4294967040  ;;  %s502_s16 = scalar_lea.vmem [#allocation10], %s1772_s20  ;;  %s509_s26 = scalar_lea.sflag [#allocation12], %s468_s27 }
  0x8e   : > { %s512_s10 = scalar_lea.vmem [#allocation11], %s1772_s20 }
  0x8f   : > { %1483 = dma.done.wait (%p1612_p6), %s509_s26, 128  }
  0x90   : > { %1485 = vsyncadd (%p1612_p6), %s509_s26, 4294967168 }
  0x91   : > { %1487 = dma.done.wait (%p56_p4), [#allocation12], 128  }
  0x92   : > { %1489 = vsyncadd (%p56_p4), [#allocation12], 4294967168  ;;  %vm584_vm0 = vcmask 64512   ;;  %v580_v0 = vld [vmem:[#allocation13] sm:$0xff]  ;;  %v582_v2 = vld [vmem:[%s492_s23] sm:$0xff]  ;;  %s1107_s24 = sshll.u32 %s1769_s13, 5 }
  0x93   : > { %v581_v1 = vld [vmem:[%s482_s11] sm:$0xff]  ;;  %603 = vmatpush.msra.mxu0 %v580_v0  ;;  %628 = vmatpush.msra.mxu1 %v580_v0  ;;  %v609_v4 = vld [vmem:[%s472_s8] sm:$0xff]  ;;  %s1911_s1 = sld [smem:[#allocation29_spill]]  ;;  %s1818_s20 = scalar_lea.vmem [#allocation14], %s1107_s24  ;;  %v1511_v25 = vmov 0   ;;  %vm783_vm6 = vcmask 7168  }
  0x94   : > { %1108 = vmatmul.msk.f32.vlgmr.msra.gmra.mxu0 %vm584_vm0, %v581_v1  ;;  %1109 = vmatmul.msk.f32.vlgmr.msra.gmra.mxu1 %vm584_vm0, %v582_v2  ;;  %v583_v3 = vld [vmem:[%s462_s29] sm:$0xff]  ;;  %v638_v5 = vld [vmem:[%s512_s10] sm:$0xff]  ;;  %vm781_vm5 = vcmp.gt.f32.partialorder %v581_v1, 0.5  ;;  %s1121_s29 = sshll.u32 %s1588_s17, 5  ;;  %s1913_s8 = sld [smem:[#allocation30_spill]] }
  0x95   : > { %v634_v6 = vld [vmem:[%s502_s16] sm:$0xff]  ;;  %vm639_vm1 = vcmp.ge.f32.partialorder %v638_v5, 0.5  ;;  %s892_s18 = sshll.u32 %s1818_s20, 4  ;;  %s879_s16 = scalar_lea.sflag [#allocation4], %s1769_s13  ;;  %s893_s18 = int_to_ptr.vmem [resolvable:$true] %s892_s18 }
  0x96   : > { %vm635_vm2 = vcmp.ge.f32.partialorder %v634_v6, 0.5  ;;  %v1206_v11 = vld [vmem:[%s1874_s7] ss:$0 sm:$0xff] }
  0x97   : > { %v1207_v12 = vld [vmem:[%s1876_s9] ss:$0 sm:$0xff] }
  0x99   : > { %v706_v16 = vld [vmem:[%s1911_s1] sm:$0x1] }
  0x9a   : > { %s890_s11 = scalar_lea.hbm %s1913_s8, %s1121_s29  ;;  %s1446_s22 = scalar_lea.hbm %s1913_s8, 64 }
  0x9b   : > { %s894_s23 = sshll.u32 %s890_s11, 4  ;;  %s895_s23 = int_to_ptr.hbm [resolvable:$true] %s894_s23 }
  0x9c   : > { %s1440_s26 = sshra.s32 %s895_s23, 4  ;;  %s1441_s26 = int_to_ptr.hbm [resolvable:$true] %s1440_s26 }
  0x9d   : > { %s1442_s10 = scalar_lea.hbm %s1441_s26, 32  ;;  %p1447_p7 = scmp.lt.s32.totalorder %s1441_s26, %s1913_s8 }
  0x9e   : > { %p1443_p4 = scmp.ne.s32.totalorder %s1441_s26, %s1442_s10  ;;  %p1448_p8 = scmp.lt.s32.totalorder %s1446_s22, %s1442_s10 }
  0xa0   : > { %p1444_p6 = pnand %p1443_p4, %p1619_p11  ;;  %p1449_p1 = por %p1448_p8, %p1447_p7 }
  0xa2   : > { %p1445_p13 = pneg %p1444_p6 }
  0xa4   : > { %p1450_p5 = pnand %p1449_p1, %p1445_p13 }
 0x111   : > { %v605_v7 = vpop.f32.mrf.mxu0  ;;  %v630_v8 = vpop.f32.mrf.mxu1 }
 0x112   : > { %v608_v9 = vadd.f32 %v605_v7, %v583_v3  ;;  %v633_v10 = vadd.f32 %v630_v8, %v609_v4 }
 0x114   : > { %v636_v13 = vmul.f32 2.0, %v608_v9  ;;  %v640_v14 = vmul.f32 2.0, %v633_v10 }
 0x116   : > { %1110 = vmatpush.xpose.msk.msra.mxu2 %vm639_vm1, %v640_v14  ;;  %1111 = vmatpush.xpose.msk.msra.mxu3 %vm639_vm1, %v640_v14  ;;  %v1811_v15 = vsel %vm635_vm2, %v636_v13, 0.0 }
 0x117   : > { %1114 = vmatpush.msk.msrb.mxu1 %vm635_vm2, %v636_v13  ;;  %v683_v17 = vmul.f32 %v1206_v11, %v1811_v15  ;;  %v678_v18 = vmul.f32 %v1207_v12, %v1811_v15  ;;  %1112 = vmatpush.msk.msrb.mxu0 %vm639_vm1, %v640_v14  ;;  %871 = vst [vmem:[%s1818_s20] sm:$0xff] %v1811_v15 }
 0x119   : > { %723 = vmatmul.f32.vlgmr.msra.gmra.mxu3 %v706_v16  ;;  %684 = vadd.xlane.f32.xlu0 %v683_v17 }
 0x11a   : > { %702 = vmatmul.f32.vlgmr.msra.gmra.mxu2 %v678_v18 }
 0x142   : > { %642 = vxpose.xlu0.b32.start.end [1/1] (short) (narrow) %v582_v2, 8 }
 0x18c   : > { %v685_v19 = vpop.xlane.xlu0 %684 }
 0x19c   : > { %v724_v21 = vpop.f32.mrf.mxu3 }
 0x19d   : > { %v703_v20 = vpop.f32.mrf.mxu2  ;;  %v727_v23 = vperm.slane %v724_v21, 0 }
 0x19e   : > { %v704_v22 = vadd.f32 %v703_v20, %v685_v19 }
 0x1a0   : > { %v728_v28 = vadd.f32 %v727_v23, %v704_v22 }
 0x1e6   : > { %v658_v24 = vpop.trf.xlu0 }
 0x1e7   : > { %vm729_vm3 = vcmp.gt.f32.partialorder %v658_v24, 0.5 }
 0x1e8   : > { %v730_v26 = vsel %vm729_vm3, 1, %v1511_v25 }
 0x1e9   : > { %v731_v27 = vperm.slane %v730_v26, 0 }
 0x1eb   : > { %vm732_vm4 = vcmp.eq.s32.totalorder %v731_v27, 1 }
 0x1ec   : > { %v733_v29 = vsel %vm732_vm4, -1e+09, %v728_v28 }
 0x1ed   : > { %v734_v30 = vsel %vm584_vm0, %v733_v29, -inf }
 0x1ee   : > { %735 = vmax.xlane.f32.xlu1 %v734_v30 }
 0x261   : > { %v736_v31 = vpop.xlane.xlu1 %735 }
 0x262   : > { %v737_v32 = vsub.f32 %v733_v29, %v736_v31  ;;  %v782_v33 = vsel %vm781_vm5, -1e+09, %v736_v31 }
 0x263   : > { %v784_v34 = vsel %vm783_vm6, %v782_v33, -inf }
 0x264   : > { %v738_v35 = vmul.f32 1.442695, %v737_v32  ;;  %v785_v36 = vrot.slane %v784_v34, 4 }
 0x266   : > { %1208 = vpow2.f32 %v738_v35  ;;  %v786_v37 = vmax.f32 %v784_v34, %v785_v36 }
 0x268   : > { %v787_v38 = vrot.slane %v786_v37, 2 }
 0x26a   : > { %v788_v39 = vmax.f32 %v786_v37, %v787_v38 }
 0x26c   : > { %v1209_v40 = vpop.eup %1208  ;;  %v789_v41 = vrot.slane %v788_v39, 1 }
 0x26d   : > { %v740_v42 = vsel %vm584_vm0, %v1209_v40, 0.0 }
 0x26e   : > { %v790_v43 = vmax.f32 %v788_v39, %v789_v41  ;;  %741 = vadd.xlane.f32.xlu1 %v740_v42 }
 0x270   : > { %v791_v44 = vsub.f32 %v782_v33, %v790_v43 }
 0x272   : > { %v792_v45 = vmul.f32 1.442695, %v791_v44 }
 0x274   : > { %1210 = vpow2.f32 %v792_v45 }
 0x27a   : > { %v1211_v46 = vpop.eup %1210 }
 0x27b   : > { %v794_v47 = vsel %vm783_vm6, %v1211_v46, 0.0 }
 0x27c   : > { %v795_v48 = vrot.slane %v794_v47, 4 }
 0x27e   : > { %v796_v49 = vadd.f32 %v795_v48, %v794_v47 }
 0x280   : > { %v797_v50 = vrot.slane %v796_v49, 2 }
 0x282   : > { %v798_v51 = vadd.f32 %v797_v50, %v796_v49 }
 0x284   : > { %v799_v52 = vrot.slane %v798_v51, 1 }
 0x286   : > { %v800_v53 = vadd.f32 %v799_v52, %v798_v51 }
 0x288   : > { %1212 = vrcp.f32 %v800_v53  ;;  %v812_v57 = vand.u32 2147483648, %v800_v53  ;;  %v810_v59 = vand.u32 2147483647, %v800_v53  ;;  %vm806_vm8 = vweird.f32 %v800_v53 }
 0x28a   : > { %v813_v61 = vor.u32 1.1754944e-38, %v812_v57  ;;  %vm811_vm10 = vcmp.eq.f32.partialorder %v810_v59, 8.507059e+37 }
 0x28e   : > { %v1213_v54 = vpop.eup %1212 }
 0x28f   : > { %v802_v55 = vmul.f32 %v1213_v54, %v800_v53  ;;  %vm807_vm7 = vweird.f32 %v1213_v54 }
 0x290   : > { %vm808_vm9 = vmor %vm806_vm8, %vm807_vm7 }
 0x291   : > { %v803_v56 = vsub.f32 1.0, %v802_v55 }
 0x293   : > { %v804_v58 = vmul.f32 %v1213_v54, %v803_v56 }
 0x295   : > { %v805_v60 = vadd.f32 %v1213_v54, %v804_v58 }
 0x297   : > { %v809_v62 = vsel %vm808_vm9, %v1213_v54, %v805_v60 }
 0x298   : > { %v814_v63 = vsel %vm811_vm10, %v813_v61, %v809_v62 }
 0x299   : > { %v815_v0 = vmul.f32 %v1211_v46, %v814_v63 }
 0x29b   : > { %816 = vxpose.xlu2.b32.start.end [1/1] (short) (narrow) %v815_v0, 8 }
 0x2e1   : > { %v742_v1 = vpop.xlane.xlu1 %741 }
 0x2e2   : > { %1214 = vrcp.f32 %v742_v1  ;;  %v754_v5 = vand.u32 2147483648, %v742_v1  ;;  %v752_v7 = vand.u32 2147483647, %v742_v1  ;;  %vm748_vm12 = vweird.f32 %v742_v1 }
 0x2e4   : > { %v755_v9 = vor.u32 1.1754944e-38, %v754_v5  ;;  %vm753_vm14 = vcmp.eq.f32.partialorder %v752_v7, 8.507059e+37 }
 0x2e8   : > { %v1215_v2 = vpop.eup %1214 }
 0x2e9   : > { %v744_v3 = vmul.f32 %v1215_v2, %v742_v1  ;;  %vm749_vm11 = vweird.f32 %v1215_v2 }
 0x2ea   : > { %vm750_vm13 = vmor %vm748_vm12, %vm749_vm11 }
 0x2eb   : > { %v745_v4 = vsub.f32 1.0, %v744_v3 }
 0x2ed   : > { %v746_v6 = vmul.f32 %v1215_v2, %v745_v4 }
 0x2ef   : > { %v747_v8 = vadd.f32 %v1215_v2, %v746_v6 }
 0x2f1   : > { %v751_v10 = vsel %vm750_vm13, %v1215_v2, %v747_v8 }
 0x2f2   : > { %v756_v11 = vsel %vm753_vm14, %v755_v9, %v751_v10 }
 0x2f3   : > { %v757_v12 = vmul.f32 %v1209_v40, %v756_v11 }
 0x2f5   : > { %1113 = vmatmul.msk.f32.vlgmr.msrb.gmra.mxu0 %vm584_vm0, %v757_v12 }
 0x334   : > { %v832_v13 = vpop.trf.xlu2 }
 0x335   : > { %1115 = vmatmul.msk.f32.vlgmr.msrb.gmra.mxu1 %vm584_vm0, %v832_v13 }
 0x372   : > { %v778_v14 = vpop.f32.mrf.mxu0 }
 0x373   : > { %872 = vst [vmem:[%s1818_s20 + $0x8] sm:$0xff] %v778_v14  ;;  %v873_v16 = vmul.f32 %v778_v14, %v1811_v15 }
 0x375   : > { %874 = vst [vmem:[%s1818_s20 + $0x10] sm:$0xff] %v873_v16 }
 0x3b2   : > { %v868_v17 = vpop.f32.mrf.mxu1 }
 0x3b3   : > { %v875_v18 = vperm.slane %v868_v17, 0 }
 0x3b5   : > { %v876_v19 = vmul.f32 %v875_v18, %v1811_v15 }
 0x3b7   : > { %877 = vst [vmem:[%s1818_s20 + $0x18] sm:$0xff] %v876_v19 }
 0x3b8   : > { %1453 = shalt.err (!%p1450_p5)
}
 0x3b9   : > { %1138 = dma.vmem_to_hbm [thread:$0]  (%p1619_p11), %s893_s18, 512, %s895_s23, %s879_s16  }
 0x3ba PF: > { %s1914_s13 = sld [smem:[#allocation21_spill]] }
 0x3bb   : > { %s1916_s30 = sld [smem:[#allocation22_spill]] }
 0x3c0   : > { %s906_s6 = sand.u32 1, %s1914_s13  }
 0x3c1   : > { %p1917_p9 = scmp.ge.s32.totalorder %s1916_s30, 2  ;;  %s907_s1 = scalar_lea.sflag [#allocation4], %s906_s6 }
 0x3c3   : > { %p1164_p10 = pnand %p1917_p9, %p1623_p12 }
 0x3c5   : > { %p1165_p0 = pneg %p1164_p10 }
 0x3c7   : > { %1491 = dma.done.wait (%p1165_p0), %s907_s1, 512  }
 0x3c8   : > { %1493 = vsyncadd (%p1165_p0), %s907_s1, 4294966784  ;;  %s1918_s16 = sld [smem:[#allocation23_spill]]  ;;  %s1920_s13 = smov %s1500_s14 }
 0x3c9   : > { %s1919_s20 = sld [smem:[#allocation24_spill]]  ;;  %s1921_s14 = smov %s1504_s15 }
 0x3ce   : > { %p32_p2 = scmp.ge.s32.totalorder %s1918_s16, 4  }
 0x3cf   : > { %s1922_s15 = smov %s1919_s20 }
 0x3d0   :  { %34 = sbr.rel (!%p32_p2) target bundleno = 16 (0x10), region = 170 }
 0x3d5   :  { %913 = vsyncpa [#allocation3], 1 }
 0x3d6   :  { %915 = vsyncpa [#allocation3 + $0x1], 1 }
 0x3d7   :  { %916 = vsyncpa [#allocation6], 1 }
 0x3d8   :  { %918 = vsyncpa [#allocation6 + $0x1], 1 }
 0x3d9   :  { %919 = vsyncpa [#allocation9], 1 }
 0x3da   :  { %921 = vsyncpa [#allocation9 + $0x1], 1 }
 0x3db   :  { %922 = vsyncpa [#allocation12], 1 }
 0x3dc   :  { %924 = vsyncpa [#allocation12 + $0x1], 1 }
 0x3dd   :  { %925 = vsyncpa [#allocation4], 1 }
 0x3de   :  { %927 = vsyncpa [#allocation4 + $0x1], 1 }

</bundles_post_ra>
